<compile_context>
chip_gen: v7x
topology: tpu7x:2x2x1
jax: 0.10.0
libtpu: 0.0.40
codegen_flags: <defaults>
</compile_context>

<pallas_src>
import functools

import jax
import jax.numpy as jnp
from jax.experimental import pallas as pl
from jax.experimental.pallas import tpu as pltpu

EPS = 1e-5
_VMEM_LIMIT = 48 * 1024 * 1024  # explicit; leaves headroom under v7x's 64 MiB


def _conv_stats_kernel(x_ref, w_ref, y_ref, stats_ref):
    """Pass 1: 1x1 conv on the MXU + compact per-step BN partial sums.

    x_ref:     (nb, Cin, thw)   input tile (Cin on sublanes, spatial on lanes)
    w_ref:     (Cout, Cin)      resident weight
    y_ref:     (nb, Cout, thw)  conv result tile (input dtype)
    stats_ref: (1, 1, Cout, 2)  col 0 = sum(y), col 1 = sum(y*y) over block
    """
    w = w_ref[...]
    nb = x_ref.shape[0]
    cout = w.shape[0]
    s = jnp.zeros((cout, 1), jnp.float32)
    sq = jnp.zeros((cout, 1), jnp.float32)
    for i in range(nb):  # nb is a small static block size (<= 8)
        y = jnp.dot(w, x_ref[i], preferred_element_type=jnp.float32)  # (Cout, thw)
        y_ref[i] = y.astype(y_ref.dtype)
        s = s + jnp.sum(y, axis=1, keepdims=True)
        sq = sq + jnp.sum(y * y, axis=1, keepdims=True)
    stats_ref[0, 0] = jnp.concatenate([s, sq], axis=1)  # (Cout, 2)


def _bn_apply_kernel(y_ref, scale_ref, shift_ref, o_ref):
    """Pass 2: out = y * scale + shift on lane/sublane-dense tiles."""
    y = y_ref[...].astype(jnp.float32)
    o_ref[...] = (y * scale_ref[...] + shift_ref[...]).astype(o_ref.dtype)


def _pick_hw_tile(hw, max_tile=1024):
    """Largest multiple-of-128 divisor of hw up to max_tile, else full hw
    (e.g. the real module's H*W = 196 becomes one full-width tile)."""
    if hw % 128 != 0:
        return hw
    t = min(max_tile, hw)
    t -= t % 128
    while hw % t != 0:
        t -= 128
    return t


def _pick_batch_block(n, bytes_per_image, max_nb=8, budget=8 * 1024 * 1024):
    """Images per grid step: <= max_nb, divides N, x block stays <= budget."""
    nb = max(1, min(max_nb, n))
    while nb > 1 and nb * bytes_per_image > budget:
        nb -= 1
    while n % nb != 0:
        nb -= 1
    return nb


def _pick_row_tile(rows, nb, itemsize, budget=2 * 1024 * 1024):
    """Sublane tile for the lane-dense pass-2 view (rows x 128)."""
    max_rows = max(8, budget // max(1, nb * 128 * itemsize))
    if rows <= max_rows or rows % 8 != 0:
        return rows
    t = (max_rows // 8) * 8
    while rows % t != 0:
        t -= 8
    return t


def conv1x1_batchnorm(x_nchw, w_oi, gamma, beta, *, eps=EPS, hw_tile=None,
                      batch_block=None):
    """x_nchw: (N, Cin, H, W); w_oi: (Cout, Cin); gamma, beta: (Cout,)."""
    N, Cin, H, W = x_nchw.shape
    Cout = w_oi.shape[0]
    HW = H * W
    CHW = Cout * HW
    itemsize = x_nchw.dtype.itemsize

    # Reshape only (no HBM transpose): (N, Cin, H, W) -> (N, Cin, HW).
    x = x_nchw.reshape(N, Cin, HW)
    w = w_oi.astype(x.dtype)  # keep model dtype (bf16 stays bf16)

    thw = hw_tile if hw_tile is not None else _pick_hw_tile(HW)
    assert HW % thw == 0, "spatial tile must divide H*W"
    T = HW // thw

    nb = batch_block if batch_block is not None else _pick_batch_block(
        N, Cin * thw * itemsize)
    assert N % nb == 0, "batch block must divide N"
    NB = N // nb

    cparams = pltpu.CompilerParams(
        dimension_semantics=("parallel", "parallel"),
        vmem_limit_bytes=_VMEM_LIMIT,
    )

    # ---- Pass 1: conv + compact per-step BN partial sums -----------------
    y, stats = pl.pallas_call(
        _conv_stats_kernel,
        out_shape=(
            jax.ShapeDtypeStruct((N, Cout, HW), x.dtype),
            jax.ShapeDtypeStruct((NB, T, Cout, 2), jnp.float32),
        ),
        grid_spec=pltpu.PrefetchScalarGridSpec(
            num_scalar_prefetch=0,
            grid=(NB, T),
            in_specs=[
                pl.BlockSpec((nb, Cin, thw), lambda b, t: (b, 0, t)),
                pl.BlockSpec((Cout, Cin), lambda b, t: (0, 0)),  # resident weight
            ],
            out_specs=(
                pl.BlockSpec((nb, Cout, thw), lambda b, t: (b, 0, t)),
                pl.BlockSpec((1, 1, Cout, 2), lambda b, t: (b, t, 0, 0)),
            ),
        ),
        compiler_params=cparams,
    )(x, w)

    # ---- Fold BN batch stats into per-channel scale/shift (tiny jnp) -----
    count = jnp.float32(N * HW)
    tot = jnp.sum(stats, axis=(0, 1))                        # (Cout, 2)
    mean = tot[:, 0] / count
    var = jnp.maximum(tot[:, 1] / count - mean * mean, 0.0)  # biased var
    inv_std = jax.lax.rsqrt(var + eps)
    g32 = gamma.astype(jnp.float32)
    b32 = beta.astype(jnp.float32)
    scale = g32 * inv_std                                    # (Cout,)
    shift = b32 - mean * scale                               # (Cout,)

    # ---- Pass 2: lane/sublane-dense normalize (y aliased to output) ------
    if CHW % 128 == 0:
        cols, rows = 128, CHW // 128
    else:  # odd shapes: one full-width row per image (correctness fallback)
        cols, rows = CHW, 1
    rt = _pick_row_tile(rows, nb, itemsize)
    assert rows % rt == 0
    R = rows // rt

    # Per-(channel, spatial) scale/shift in the flattened layout; constant
    # index along the batch grid axis keeps them effectively VMEM-resident.
    scale3 = jnp.broadcast_to(scale[:, None], (Cout, HW)).reshape(1, rows, cols)
    shift3 = jnp.broadcast_to(shift[:, None], (Cout, HW)).reshape(1, rows, cols)
    y3 = y.reshape(N, rows, cols)

    out = pl.pallas_call(
        _bn_apply_kernel,
        out_shape=jax.ShapeDtypeStruct((N, rows, cols), x_nchw.dtype),
        grid_spec=pltpu.PrefetchScalarGridSpec(
            num_scalar_prefetch=0,
            grid=(NB, R),
            in_specs=[
                pl.BlockSpec((nb, rt, cols), lambda b, r: (b, r, 0)),
                pl.BlockSpec((1, rt, cols), lambda b, r: (0, r, 0)),
                pl.BlockSpec((1, rt, cols), lambda b, r: (0, r, 0)),
            ],
            out_specs=pl.BlockSpec((nb, rt, cols), lambda b, r: (b, r, 0)),
        ),
        compiler_params=cparams,
        input_output_aliases={0: 0},  # reuse y's HBM buffer for the output
    )(y3, scale3, shift3)

    # (N, rows, cols) -> (N, Cout, H, W): reshape only, no transpose.
    return out.reshape(N, Cout, H, W)


def reference(x_nchw, w_oi, gamma, beta, eps=EPS):
    # Pure-JAX reference: 1x1 conv + training-mode BN (batch stats).
    y = jnp.einsum("nchw,oc->nohw", x_nchw, w_oi)
    mean = jnp.mean(y, axis=(0, 2, 3), keepdims=True)
    var = jnp.mean((y - mean) ** 2, axis=(0, 2, 3), keepdims=True)
    xhat = (y - mean) * jax.lax.rsqrt(var + eps)
    return xhat * gamma.reshape(1, -1, 1, 1) + beta.reshape(1, -1, 1, 1)


if __name__ == "__main__":
    # Small shapes consistent with the module's structure (N, Cin, H, W).
    N, Cin, Cout, H, W = 4, 64, 32, 16, 16

    key = jax.random.PRNGKey(0)
    kx, kw, kg, kb = jax.random.split(key, 4)

    x = jax.random.normal(kx, (N, Cin, H, W), dtype=jnp.float32)
    # Conv2d(960, 128, 1, 1, bias=False) analogue weight.
    w = jax.random.normal(kw, (Cout, Cin), dtype=jnp.float32) * (1.0 / Cin) ** 0.5
    # Non-trivial BN affine to exercise the scale/shift path.
    gamma = 1.0 + 0.1 * jax.random.normal(kg, (Cout,), dtype=jnp.float32)
    beta = 0.1 * jax.random.normal(kb, (Cout,), dtype=jnp.float32)

    # hw_tile=128 -> 2 spatial tiles; batch_block=2 -> 2 batch blocks,
    # exercising the (NB, T) grid and the cross-block stats reduction.
    fn = jax.jit(functools.partial(conv1x1_batchnorm, hw_tile=128, batch_block=2))
    out = jax.block_until_ready(fn(x, w, gamma, beta))

    ref = reference(x, w, gamma, beta)
    assert out.shape == (N, Cout, H, W)
    err = float(jnp.max(jnp.abs(out - ref)))
    assert jnp.allclose(out, ref, atol=1e-4, rtol=1e-4), err

    print("KERNEL_OK")
</pallas_src>

<mosaic_0001>
module attributes {stable_mosaic.version = 11 : i64} {
  func.func @_conv_stats_kernel(%arg0: i32, %arg1: i32, %arg2: memref<2x64x128xf32, #tpu.memory_space<vmem>>, %arg3: memref<32x64xf32, #tpu.memory_space<vmem>>, %arg4: memref<2x32x128xf32, #tpu.memory_space<vmem>>, %arg5: memref<1x1x32x2xf32, #tpu.memory_space<vmem>>) attributes {dimension_semantics = [#tpu.dimension_semantics<parallel>, #tpu.dimension_semantics<parallel>], iteration_bounds = array<i64: 2, 2>, scalar_prefetch = 0 : i64, scratch_operands = 0 : i64, tpu.core_type = #tpu.core_type<tc>, window_params = [{transform_indices = @transform_0, window_bounds = array<i64: 2, 64, 128>}, {pipeline_mode = #tpu.pipeline_mode<synchronous>, transform_indices = @transform_1, window_bounds = array<i64: 32, 64>}, {transform_indices = @transform_2, window_bounds = array<i64: 2, 32, 128>}, {transform_indices = @transform_3, window_bounds = array<i64: 1, 1, 32, 2>}]} {
    %c0 = arith.constant 0 : index
    %c0_0 = arith.constant 0 : index
    %0 = vector.load %arg3[%c0, %c0_0] : memref<32x64xf32, #tpu.memory_space<vmem>>, vector<32x64xf32>
    %cst = arith.constant 0.000000e+00 : f32
    %1 = vector.broadcast %cst : f32 to vector<32x1xf32>
    %cst_1 = arith.constant 0.000000e+00 : f32
    %2 = vector.broadcast %cst_1 : f32 to vector<32x1xf32>
    %c0_2 = arith.constant 0 : index
    %c0_3 = arith.constant 0 : index
    %c0_4 = arith.constant 0 : index
    %3 = vector.load %arg2[%c0_2, %c0_3, %c0_4] : memref<2x64x128xf32, #tpu.memory_space<vmem>>, vector<1x64x128xf32>
    %4 = vector.shape_cast %3 : vector<1x64x128xf32> to vector<64x128xf32>
    %cst_5 = arith.constant dense<0.000000e+00> : vector<32x128xf32>
    %5 = tpu.matmul %0, %4, %cst_5 {dimension_numbers = #tpu.dot_dimension_numbers<[1], [0], [0], [1], [0, 0, 1, 1], [], []>} : vector<32x64xf32>, vector<64x128xf32>, vector<32x128xf32> -> vector<32x128xf32>
    %c0_6 = arith.constant 0 : index
    %c0_7 = arith.constant 0 : index
    %c0_8 = arith.constant 0 : index
    %6 = vector.load %arg4[%c0_6, %c0_7, %c0_8] : memref<2x32x128xf32, #tpu.memory_space<vmem>>, vector<1x32x128xf32>
    %7 = vector.shape_cast %6 : vector<1x32x128xf32> to vector<32x128xf32>
    %8 = vector.shape_cast %5 : vector<32x128xf32> to vector<1x32x128xf32>
    tpu.vector_store %arg4[%c0_6, %c0_7, %c0_8], %8 {strides = array<i32>} : memref<2x32x128xf32, #tpu.memory_space<vmem>>, vector<1x32x128xf32>,
    %cst_9 = arith.constant dense<0.000000e+00> : vector<32xf32>
    %9 = vector.multi_reduction <add>, %5, %cst_9 [1] : vector<32x128xf32> to vector<32xf32>
    %10 = vector.shape_cast %9 : vector<32xf32> to vector<32x1xf32>
    %11 = arith.addf %1, %10 : vector<32x1xf32>
    %12 = arith.mulf %5, %5 : vector<32x128xf32>
    %cst_10 = arith.constant dense<0.000000e+00> : vector<32xf32>
    %13 = vector.multi_reduction <add>, %12, %cst_10 [1] : vector<32x128xf32> to vector<32xf32>
    %14 = vector.shape_cast %13 : vector<32xf32> to vector<32x1xf32>
    %15 = arith.addf %2, %14 : vector<32x1xf32>
    %c1 = arith.constant 1 : index
    %c0_11 = arith.constant 0 : index
    %c0_12 = arith.constant 0 : index
    %16 = vector.load %arg2[%c1, %c0_11, %c0_12] : memref<2x64x128xf32, #tpu.memory_space<vmem>>, vector<1x64x128xf32>
    %17 = vector.shape_cast %16 : vector<1x64x128xf32> to vector<64x128xf32>
    %cst_13 = arith.constant dense<0.000000e+00> : vector<32x128xf32>
    %18 = tpu.matmul %0, %17, %cst_13 {dimension_numbers = #tpu.dot_dimension_numbers<[1], [0], [0], [1], [0, 0, 1, 1], [], []>} : vector<32x64xf32>, vector<64x128xf32>, vector<32x128xf32> -> vector<32x128xf32>
    %c1_14 = arith.constant 1 : index
    %c0_15 = arith.constant 0 : index
    %c0_16 = arith.constant 0 : index
    %19 = vector.load %arg4[%c1_14, %c0_15, %c0_16] : memref<2x32x128xf32, #tpu.memory_space<vmem>>, vector<1x32x128xf32>
    %20 = vector.shape_cast %19 : vector<1x32x128xf32> to vector<32x128xf32>
    %21 = vector.shape_cast %18 : vector<32x128xf32> to vector<1x32x128xf32>
    tpu.vector_store %arg4[%c1_14, %c0_15, %c0_16], %21 {strides = array<i32>} : memref<2x32x128xf32, #tpu.memory_space<vmem>>, vector<1x32x128xf32>,
    %cst_17 = arith.constant dense<0.000000e+00> : vector<32xf32>
    %22 = vector.multi_reduction <add>, %18, %cst_17 [1] : vector<32x128xf32> to vector<32xf32>
    %23 = vector.shape_cast %22 : vector<32xf32> to vector<32x1xf32>
    %24 = arith.addf %11, %23 : vector<32x1xf32>
    %25 = arith.mulf %18, %18 : vector<32x128xf32>
    %cst_18 = arith.constant dense<0.000000e+00> : vector<32xf32>
    %26 = vector.multi_reduction <add>, %25, %cst_18 [1] : vector<32x128xf32> to vector<32xf32>
    %27 = vector.shape_cast %26 : vector<32xf32> to vector<32x1xf32>
    %28 = arith.addf %15, %27 : vector<32x1xf32>
    %29 = tpu.concatenate %24, %28 in 1 : vector<32x1xf32>, vector<32x1xf32> -> vector<32x2xf32>
    %c0_19 = arith.constant 0 : index
    %c0_20 = arith.constant 0 : index
    %c0_21 = arith.constant 0 : index
    %c0_22 = arith.constant 0 : index
    %30 = vector.load %arg5[%c0_19, %c0_20, %c0_21, %c0_22] : memref<1x1x32x2xf32, #tpu.memory_space<vmem>>, vector<1x1x32x2xf32>
    %31 = vector.shape_cast %30 : vector<1x1x32x2xf32> to vector<32x2xf32>
    %32 = vector.shape_cast %29 : vector<32x2xf32> to vector<1x1x32x2xf32>
    tpu.vector_store %arg5[%c0_19, %c0_20, %c0_21, %c0_22], %32 {strides = array<i32>} : memref<1x1x32x2xf32, #tpu.memory_space<vmem>>, vector<1x1x32x2xf32>,
    return
  }
  func.func @transform_0(%arg0: i32, %arg1: i32) -> (i32, i32, i32) {
    %c0_i32 = arith.constant 0 : i32
    %c0_i32_0 = arith.constant 0 : i32
    return %arg0, %c0_i32, %arg1 : i32, i32, i32
  }
  func.func @transform_1(%arg0: i32, %arg1: i32) -> (i32, i32) {
    %c0_i32 = arith.constant 0 : i32
    %c0_i32_0 = arith.constant 0 : i32
    %c0_i32_1 = arith.constant 0 : i32
    return %c0_i32, %c0_i32_0 : i32, i32
  }
  func.func @transform_2(%arg0: i32, %arg1: i32) -> (i32, i32, i32) {
    %c0_i32 = arith.constant 0 : i32
    %c0_i32_0 = arith.constant 0 : i32
    return %arg0, %c0_i32, %arg1 : i32, i32, i32
  }
  func.func @transform_3(%arg0: i32, %arg1: i32) -> (i32, i32, i32, i32) {
    %c0_i32 = arith.constant 0 : i32
    %c0_i32_0 = arith.constant 0 : i32
    %c0_i32_1 = arith.constant 0 : i32
    return %arg0, %arg1, %c0_i32, %c0_i32_0 : i32, i32, i32, i32
  }
}

module attributes {stable_mosaic.version = 11 : i64} {
  func.func @_bn_apply_kernel(%arg0: i32, %arg1: i32, %arg2: memref<2x64x128xf32, #tpu.memory_space<vmem>>, %arg3: memref<1x64x128xf32, #tpu.memory_space<vmem>>, %arg4: memref<1x64x128xf32, #tpu.memory_space<vmem>>, %arg5: memref<2x64x128xf32, #tpu.memory_space<vmem>>) attributes {dimension_semantics = [#tpu.dimension_semantics<parallel>, #tpu.dimension_semantics<parallel>], iteration_bounds = array<i64: 2, 1>, scalar_prefetch = 0 : i64, scratch_operands = 0 : i64, tpu.core_type = #tpu.core_type<tc>, window_params = [{transform_indices = @transform_0, window_bounds = array<i64: 2, 64, 128>}, {transform_indices = @transform_1, window_bounds = array<i64: 1, 64, 128>}, {transform_indices = @transform_2, window_bounds = array<i64: 1, 64, 128>}, {transform_indices = @transform_3, window_bounds = array<i64: 2, 64, 128>}]} {
    %c0 = arith.constant 0 : index
    %c0_0 = arith.constant 0 : index
    %c0_1 = arith.constant 0 : index
    %0 = vector.load %arg2[%c0, %c0_0, %c0_1] : memref<2x64x128xf32, #tpu.memory_space<vmem>>, vector<2x64x128xf32>
    %c0_2 = arith.constant 0 : index
    %c0_3 = arith.constant 0 : index
    %c0_4 = arith.constant 0 : index
    %1 = vector.load %arg3[%c0_2, %c0_3, %c0_4] : memref<1x64x128xf32, #tpu.memory_space<vmem>>, vector<1x64x128xf32>
    %2 = vector.broadcast %1 : vector<1x64x128xf32> to vector<2x64x128xf32>
    %3 = arith.mulf %0, %2 : vector<2x64x128xf32>
    %c0_5 = arith.constant 0 : index
    %c0_6 = arith.constant 0 : index
    %c0_7 = arith.constant 0 : index
    %4 = vector.load %arg4[%c0_5, %c0_6, %c0_7] : memref<1x64x128xf32, #tpu.memory_space<vmem>>, vector<1x64x128xf32>
    %5 = vector.broadcast %4 : vector<1x64x128xf32> to vector<2x64x128xf32>
    %6 = arith.addf %3, %5 : vector<2x64x128xf32>
    %c0_8 = arith.constant 0 : index
    %c0_9 = arith.constant 0 : index
    %c0_10 = arith.constant 0 : index
    %7 = vector.load %arg5[%c0_8, %c0_9, %c0_10] : memref<2x64x128xf32, #tpu.memory_space<vmem>>, vector<2x64x128xf32>
    tpu.vector_store %arg5[%c0_8, %c0_9, %c0_10], %6 {strides = array<i32>} : memref<2x64x128xf32, #tpu.memory_space<vmem>>, vector<2x64x128xf32>,
    return
  }
  func.func @transform_0(%arg0: i32, %arg1: i32) -> (i32, i32, i32) {
    %c0_i32 = arith.constant 0 : i32
    %c0_i32_0 = arith.constant 0 : i32
    return %arg0, %arg1, %c0_i32 : i32, i32, i32
  }
  func.func @transform_1(%arg0: i32, %arg1: i32) -> (i32, i32, i32) {
    %c0_i32 = arith.constant 0 : i32
    %c0_i32_0 = arith.constant 0 : i32
    %c0_i32_1 = arith.constant 0 : i32
    return %c0_i32, %arg1, %c0_i32_0 : i32, i32, i32
  }
  func.func @transform_2(%arg0: i32, %arg1: i32) -> (i32, i32, i32) {
    %c0_i32 = arith.constant 0 : i32
    %c0_i32_0 = arith.constant 0 : i32
    %c0_i32_1 = arith.constant 0 : i32
    return %c0_i32, %arg1, %c0_i32_0 : i32, i32, i32
  }
  func.func @transform_3(%arg0: i32, %arg1: i32) -> (i32, i32, i32) {
    %c0_i32 = arith.constant 0 : i32
    %c0_i32_0 = arith.constant 0 : i32
    return %arg0, %arg1, %c0_i32 : i32, i32, i32
  }
}

</mosaic_0001>

<bundles_post_ra>
// kernel: conv1x1_batchnorm.3
= control target key start
LH: loop header
LB: loop body
LE: loop exit
PB: predicated region body
PF: predicated region fallthrough
CT: control target
= control target key end

     0   :  { %s547_s12 = smov 0   ;;  %s549_s13 = smov 0   ;;  %s664_s0 = inlined_call_operand.vmem [shape: f32[4,64,128], index: 0, kind: input, shape index: {}, may-alias: {0,3}]   ;;  %s665_s1 = inlined_call_operand.vmem [shape: f32[1,64,128], index: 1, kind: input, shape index: {}]   ;;  %s666_s2 = inlined_call_operand.vmem [shape: f32[1,64,128], index: 2, kind: input, shape index: {}]   ;;  %s667_s3 = inlined_call_operand.vmem [shape: f32[4,64,128], index: 3, kind: output, shape index: {}, may-alias: {0,3}]  }
   0x1   :  { %s551_s14 = smov 0  }
   0x2 LB: > { %s25_s15 = sadd.s32 1, %s521_s13  ;;  %p468_p0 = scmp.ge.s32.totalorder %s525_s14, 1  ;;  %s525_s14 = sphi %s551_s14, %s13_s14   ;;  %s521_s13 = sphi %s549_s13, %s669_s13   ;;  %s517_s12 = sphi %s547_s12, %s668_s12  }
   0x3   : > { %p27_p1 = scmp.ge.s32.totalorder %s25_s15, 2  ;;  %p182_p2 = scmp.lt.s32.totalorder %s525_s14, 3 }
   0x5   : > { %s671_s15 = smov (%p27_p1, %s25_s15), 0  ;;  %p183_p3 = pnand %p468_p0, %p182_p2 }
   0x6   : > { %s469_s16 = sshll.u32 (!%p183_p3), %s517_s12, 1  ;;  %v278_v0 = vld [vmem:[%s665_s1] sm:$0xff] (!%p183_p3)  ;;  %v279_v2 = vld [vmem:[%s665_s1 + $0x8] sm:$0xff] (!%p183_p3)  ;;  %v280_v4 = vld [vmem:[%s665_s1 + $0x10] sm:$0xff] (!%p183_p3) }
   0x7   : > { %186 = sbr.rel (%p183_p3) target bundleno = 38 (0x26), region = 32  ;;  %p228_p4 = scmp.lt.s32.totalorder (!%p183_p3), %s469_s16, 3  ;;  %v302_v1 = vld [vmem:[%s666_s2] sm:$0xff] (!%p183_p3)  ;;  %v303_v3 = vld [vmem:[%s666_s2 + $0x8] sm:$0xff] (!%p183_p3)  ;;  %v304_v5 = vld [vmem:[%s666_s2 + $0x10] sm:$0xff] (!%p183_p3) }
   0x8   : > { %v281_v6 = vld [vmem:[%s665_s1 + $0x18] sm:$0xff] (!%p183_p3)  ;;  %v282_v7 = vld [vmem:[%s665_s1 + $0x20] sm:$0xff] (!%p183_p3)  ;;  %v283_v8 = vld [vmem:[%s665_s1 + $0x28] sm:$0xff] (!%p183_p3) }
   0x9   : > { %v305_v12 = vld [vmem:[%s666_s2 + $0x18] sm:$0xff] (!%p183_p3)  ;;  %v284_v13 = vld [vmem:[%s665_s1 + $0x30] sm:$0xff] (!%p183_p3)  ;;  %v306_v19 = vld [vmem:[%s666_s2 + $0x20] sm:$0xff] (!%p183_p3) }
   0xa   : > { %v307_v20 = vld [vmem:[%s666_s2 + $0x28] sm:$0xff] (!%p183_p3)  ;;  %v285_v21 = vld [vmem:[%s665_s1 + $0x38] sm:$0xff] (!%p183_p3)  ;;  %v308_v29 = vld [vmem:[%s666_s2 + $0x30] sm:$0xff] (!%p183_p3) }
   0xb   : > { %v309_v49 = vld [vmem:[%s666_s2 + $0x38] sm:$0xff] (!%p183_p3) }
   0xe   : > { %s673_s16 = smov (!%p228_p4, %s469_s16), 3 }
   0xf   : > { %s477_s19 = sshll.u32 %s673_s16, 6 }
  0x10   : > { %s583_s30 = scalar_lea.vmem %s664_s0, %s477_s19  ;;  %s621_s28 = scalar_lea.vmem %s667_s3, %s477_s19 }
  0x11   : > { %v262_v9 = vld [vmem:[%s583_s30] sm:$0xff]  ;;  %v263_v11 = vld [vmem:[%s583_s30 + $0x8] sm:$0xff]  ;;  %v264_v17 = vld [vmem:[%s583_s30 + $0x10] sm:$0xff] }
  0x12   : > { %v270_v10 = vld [vmem:[%s583_s30 + $0x40] sm:$0xff]  ;;  %v286_v14 = vmul.f32 %v278_v0, %v262_v9  ;;  %v271_v15 = vld [vmem:[%s583_s30 + $0x48] sm:$0xff]  ;;  %v287_v16 = vmul.f32 %v279_v2, %v263_v11  ;;  %v272_v18 = vld [vmem:[%s583_s30 + $0x50] sm:$0xff]  ;;  %v288_v24 = vmul.f32 %v280_v4, %v264_v17 }
  0x13   : > { %v294_v22 = vmul.f32 %v278_v0, %v270_v10  ;;  %v295_v23 = vmul.f32 %v279_v2, %v271_v15  ;;  %v296_v25 = vmul.f32 %v280_v4, %v272_v18  ;;  %v265_v26 = vld [vmem:[%s583_s30 + $0x18] sm:$0xff]  ;;  %v266_v28 = vld [vmem:[%s583_s30 + $0x20] sm:$0xff]  ;;  %v267_v35 = vld [vmem:[%s583_s30 + $0x28] sm:$0xff] }
  0x14   : > { %v273_v27 = vld [vmem:[%s583_s30 + $0x58] sm:$0xff]  ;;  %v310_v30 = vadd.f32 %v302_v1, %v286_v14  ;;  %v311_v31 = vadd.f32 %v303_v3, %v287_v16  ;;  %v289_v32 = vmul.f32 %v281_v6, %v265_v26  ;;  %v274_v34 = vld [vmem:[%s583_s30 + $0x60] sm:$0xff]  ;;  %v275_v36 = vld [vmem:[%s583_s30 + $0x68] sm:$0xff]  ;;  %v312_v37 = vadd.f32 %v304_v5, %v288_v24 }
  0x15   : > { %v297_v33 = vmul.f32 %v281_v6, %v273_v27  ;;  %v290_v38 = vmul.f32 %v282_v7, %v266_v28  ;;  %v298_v39 = vmul.f32 %v282_v7, %v274_v34  ;;  %v291_v40 = vmul.f32 %v283_v8, %v267_v35  ;;  %v268_v41 = vld [vmem:[%s583_s30 + $0x30] sm:$0xff]  ;;  %v269_v43 = vld [vmem:[%s583_s30 + $0x38] sm:$0xff] }
  0x16   : > { %v276_v42 = vld [vmem:[%s583_s30 + $0x70] sm:$0xff]  ;;  %v313_v44 = vadd.f32 %v305_v12, %v289_v32  ;;  %v299_v45 = vmul.f32 %v283_v8, %v275_v36  ;;  %v292_v46 = vmul.f32 %v284_v13, %v268_v41  ;;  %v293_v52 = vmul.f32 %v285_v21, %v269_v43 }
  0x17   : > { %326 = vst [vmem:[%s621_s28] sm:$0xff] %v310_v30  ;;  %327 = vst [vmem:[%s621_s28 + $0x8] sm:$0xff] %v311_v31  ;;  %v300_v47 = vmul.f32 %v284_v13, %v276_v42  ;;  %v314_v50 = vadd.f32 %v306_v19, %v290_v38  ;;  %v315_v51 = vadd.f32 %v307_v20, %v291_v40 }
  0x18   : > { %v316_v54 = vadd.f32 %v308_v29, %v292_v46  ;;  %v318_v55 = vadd.f32 %v302_v1, %v294_v22  ;;  %v319_v56 = vadd.f32 %v303_v3, %v295_v23  ;;  %v320_v57 = vadd.f32 %v304_v5, %v296_v25 }
  0x19   : > { %v317_v58 = vadd.f32 %v309_v49, %v293_v52  ;;  %v321_v59 = vadd.f32 %v305_v12, %v297_v33  ;;  %v322_v60 = vadd.f32 %v306_v19, %v298_v39  ;;  %v323_v61 = vadd.f32 %v307_v20, %v299_v45 }
  0x1a   : > { %v324_v62 = vadd.f32 %v308_v29, %v300_v47 }
  0x1e   : > { %v277_v48 = vld [vmem:[%s583_s30 + $0x78] sm:$0xff] }
  0x1f   : > { %328 = vst [vmem:[%s621_s28 + $0x10] sm:$0xff] %v312_v37  ;;  %v301_v53 = vmul.f32 %v285_v21, %v277_v48  ;;  %329 = vst [vmem:[%s621_s28 + $0x18] sm:$0xff] %v313_v44 }
  0x20   : > { %330 = vst [vmem:[%s621_s28 + $0x20] sm:$0xff] %v314_v50  ;;  %331 = vst [vmem:[%s621_s28 + $0x28] sm:$0xff] %v315_v51 }
  0x21   : > { %332 = vst [vmem:[%s621_s28 + $0x30] sm:$0xff] %v316_v54  ;;  %334 = vst [vmem:[%s621_s28 + $0x40] sm:$0xff] %v318_v55  ;;  %v325_v63 = vadd.f32 %v309_v49, %v301_v53 }
  0x22   : > { %335 = vst [vmem:[%s621_s28 + $0x48] sm:$0xff] %v319_v56  ;;  %336 = vst [vmem:[%s621_s28 + $0x50] sm:$0xff] %v320_v57 }
  0x23   : > { %333 = vst [vmem:[%s621_s28 + $0x38] sm:$0xff] %v317_v58  ;;  %337 = vst [vmem:[%s621_s28 + $0x58] sm:$0xff] %v321_v59 }
  0x24   : > { %338 = vst [vmem:[%s621_s28 + $0x60] sm:$0xff] %v322_v60  ;;  %339 = vst [vmem:[%s621_s28 + $0x68] sm:$0xff] %v323_v61 }
  0x25   : > { %340 = vst [vmem:[%s621_s28 + $0x70] sm:$0xff] %v324_v62  ;;  %341 = vst [vmem:[%s621_s28 + $0x78] sm:$0xff] %v325_v63 }
  0x26 PF: > { %s13_s14 = sadd.s32 1, %s525_s14   ;;  %s668_s12 = smov %s521_s13 }
  0x27   : > { %p10_p5 = scmp.ge.s32.totalorder %s13_s14, 4   ;;  %s669_s13 = smov %s671_s15 }
  0x29   :  { %12 = sbr.rel (!%p10_p5) target bundleno = 2 (0x2), region = 68 }

// kernel: conv1x1_batchnorm.2
= control target key start
LH: loop header
LB: loop body
LE: loop exit
PB: predicated region body
PF: predicated region fallthrough
CT: control target
= control target key end

     0   :  { %s1053_s12 = smov 0   ;;  %s1055_s13 = smov 0   ;;  %s1224_s0 = inlined_call_operand.vmem [shape: f32[4,64,256], index: 0, kind: input, shape index: {}]   ;;  %s1225_s1 = inlined_call_operand.vmem [shape: f32[32,64], index: 1, kind: input, shape index: {}]   ;;  %s1226_s2 = inlined_call_operand.vmem [shape: f32[4,32,256], index: 2, kind: output, shape index: {0}]   ;;  %s1227_s3 = inlined_call_operand.vmem [shape: f32[2,2,32,2], index: 3, kind: output, shape index: {1}]  }
   0x1   :  { %s1057_s14 = smov 0   ;;  %s1059_s15 = smov 0  }
   0x2   :  { %s1061_s16 = smov 0   ;;  %s1063_s17 = smov 0  }
   0x3   :  { %s1065_s18 = smov 0  }
   0x4 LB: > { %s23_s19 = sadd.s32 1, %s1023_s16  ;;  %s26_s20 = sadd.s32 1, %s1027_s17  ;;  %s1031_s18 = sphi %s1065_s18, %s14_s18   ;;  %s1027_s17 = sphi %s1063_s17, %s1234_s17   ;;  %s1023_s16 = sphi %s1061_s16, %s1233_s16   ;;  %s1019_s15 = sphi %s1059_s15, %s1232_s15   ;;  %s1015_s14 = sphi %s1057_s14, %s1231_s14   ;;  %s1011_s13 = sphi %s1055_s13, %s1230_s13   ;;  %s1007_s12 = sphi %s1053_s12, %s1229_s12  }
   0x5   : > { %p24_p0 = scmp.ge.s32.totalorder %s23_s19, 2  ;;  %s779_s21 = sadd.s32 4294967295, %s1031_s18  }
   0x6   : > { %p42_p1 = scmp.ne.s32.totalorder %s1011_s13, %s1007_s12  ;;  %p43_p2 = scmp.eq.s32.totalorder %s1031_s18, 0 }
   0x7   : > { %s1236_s19 = smov (%p24_p0, %s23_s19), 0  ;;  %s1238_s20 = smov (!%p24_p0, %s26_s20), %s1027_s17 }
   0x8   : > { %p28_p3 = scmp.ge.s32.totalorder %s1238_s20, 2  ;;  %p95_p4 = scmp.eq.s32.totalorder %s779_s21, 3 }
   0x9   : > { %s31_s22 = ssub.s32 %s1023_s16, %s1236_s19  ;;  %p44_p5 = por %p43_p2, %p42_p1 }
   0xa   : > { %s1240_s20 = smov (%p28_p3, %s1238_s20), 0  ;;  %p1101_p6 = por %p95_p4, %p42_p1 }
   0xb   : > { %s30_s24 = ssub.s32 %s1027_s17, %s1240_s20  ;;  %s35_s26 = sadd.s32 1, %s1011_s13 }
   0xc   : > { %s32_s25 = sor.u32 %s31_s22, %s30_s24  ;;  %p782_p8 = scmp.ge.s32.totalorder %s1031_s18, 4 }
   0xd   : > { %p33_p7 = scmp.eq.s32.totalorder %s32_s25, 0 }
   0xe   : > { %148 = sbr.rel (%p782_p8) target bundleno = 35 (0x23), region = 20 }
   0xf   : > { %s1109_s27 = scalar_select %p33_p7, %s1011_s13, %s35_s26  }
  0x15   : > { %151 = sbr.rel (!%p44_p5) target bundleno = 35 (0x23), region = 24  ;;  %s153_s28 = sand.u32 (%p44_p5), 1, %s1011_s13  }
  0x16   : > { %s819_s29 = sshll.u32 (%p44_p5), %s1027_s17, 5  ;;  %s783_s30 = sshll.u32 (%p44_p5), %s153_s28, 7 }
  0x17   : > { %s158_s4 = sadd.s32 (%p44_p5), %s1023_s16, %s819_s29  ;;  %s155_s9 = scalar_lea.vmem (%p44_p5), [#allocation2], %s783_s30 }
  0x18   : > { %s786_s5 = sshll.u32 (%p44_p5), %s158_s4, 3 }
  0x19   : > { %s1118_s8 = scalar_lea.vmem (%p44_p5), %s1224_s0, %s786_s5 }
  0x1a   : > { %v218_v0 = vld [vmem:[%s1118_s8] sm:$0xff] (%p44_p5)  ;;  %v220_v1 = vld [vmem:[%s1118_s8 + $0x10] sm:$0xff] (%p44_p5) }
  0x1b   : > { %v222_v2 = vld [vmem:[%s1118_s8 + $0x20] sm:$0xff] (%p44_p5)  ;;  %219 = vst [vmem:[%s155_s9] sm:$0xff] (%p44_p5), %v218_v0  ;;  %221 = vst [vmem:[%s155_s9 + $0x8] sm:$0xff] (%p44_p5), %v220_v1  ;;  %v224_v3 = vld [vmem:[%s1118_s8 + $0x30] sm:$0xff] (%p44_p5) }
  0x1c   : > { %223 = vst [vmem:[%s155_s9 + $0x10] sm:$0xff] %v222_v2  ;;  %v226_v4 = vld [vmem:[%s1118_s8 + $0x40] sm:$0xff]  ;;  %v228_v5 = vld [vmem:[%s1118_s8 + $0x50] sm:$0xff]  ;;  %225 = vst [vmem:[%s155_s9 + $0x18] sm:$0xff] %v224_v3 }
  0x1d   : > { %227 = vst [vmem:[%s155_s9 + $0x20] sm:$0xff] %v226_v4  ;;  %229 = vst [vmem:[%s155_s9 + $0x28] sm:$0xff] %v228_v5  ;;  %v230_v6 = vld [vmem:[%s1118_s8 + $0x60] sm:$0xff]  ;;  %v232_v7 = vld [vmem:[%s1118_s8 + $0x70] sm:$0xff] }
  0x1e   : > { %v234_v8 = vld [vmem:[%s1118_s8 + $0x80] sm:$0xff]  ;;  %231 = vst [vmem:[%s155_s9 + $0x30] sm:$0xff] %v230_v6  ;;  %233 = vst [vmem:[%s155_s9 + $0x38] sm:$0xff] %v232_v7  ;;  %v236_v9 = vld [vmem:[%s1118_s8 + $0x90] sm:$0xff] }
  0x1f   : > { %235 = vst [vmem:[%s155_s9 + $0x40] sm:$0xff] %v234_v8  ;;  %v238_v10 = vld [vmem:[%s1118_s8 + $0xa0] sm:$0xff]  ;;  %v240_v11 = vld [vmem:[%s1118_s8 + $0xb0] sm:$0xff]  ;;  %237 = vst [vmem:[%s155_s9 + $0x48] sm:$0xff] %v236_v9 }
  0x20   : > { %239 = vst [vmem:[%s155_s9 + $0x50] sm:$0xff] %v238_v10  ;;  %241 = vst [vmem:[%s155_s9 + $0x58] sm:$0xff] %v240_v11  ;;  %v242_v12 = vld [vmem:[%s1118_s8 + $0xc0] sm:$0xff]  ;;  %v244_v13 = vld [vmem:[%s1118_s8 + $0xd0] sm:$0xff] }
  0x21   : > { %v246_v14 = vld [vmem:[%s1118_s8 + $0xe0] sm:$0xff]  ;;  %243 = vst [vmem:[%s155_s9 + $0x60] sm:$0xff] %v242_v12  ;;  %245 = vst [vmem:[%s155_s9 + $0x68] sm:$0xff] %v244_v13  ;;  %v248_v15 = vld [vmem:[%s1118_s8 + $0xf0] sm:$0xff] }
  0x22   : > { %247 = vst [vmem:[%s155_s9 + $0x70] sm:$0xff] %v246_v14  ;;  %249 = vst [vmem:[%s155_s9 + $0x78] sm:$0xff] %v248_v15 }
  0x23 PF: > { %p787_p9 = scmp.ge.s32.totalorder %s1031_s18, 1  ;;  %p254_p10 = scmp.lt.s32.totalorder %s1031_s18, 5 }
  0x25   : > { %p255_p11 = pnand %p787_p9, %p254_p10 }
  0x26   : > { %s261_s10 = sand.u32 (!%p255_p11), 1, %s1007_s12   ;;  %v303_v16 = vld [vmem:[%s1225_s1] sm:$0xff] (!%p255_p11)  ;;  %vm315_vm0 = vcmask (!%p255_p11), 523264   ;;  %v304_v41 = vld [vmem:[%s1225_s1 + $0x8] sm:$0xff] (!%p255_p11)  ;;  %v305_v42 = vld [vmem:[%s1225_s1 + $0x10] sm:$0xff] (!%p255_p11)  ;;  %p294_p12 = scmp.lt.s32.totalorder (!%p255_p11), %s1019_s15, 1 }
  0x27   : > { %258 = sbr.rel (%p255_p11) target bundleno = 447 (0x1bf), region = 62  ;;  %s788_s22 = sshll.u32 (!%p255_p11), %s261_s10, 7  ;;  %861 = vmatprep.mubr.msk.f32.mxu0 (!%p255_p11), %vm315_vm0, %v303_v16  ;;  %883 = vmatprep.mubr.msk.f32.mxu1 (!%p255_p11), %vm315_vm0, %v303_v16  ;;  %v306_v43 = vld [vmem:[%s1225_s1 + $0x18] sm:$0xff] (!%p255_p11)  ;;  %vm572_vm1 = vcmask (!%p255_p11), 7168   ;;  %vm577_vm2 = vcmask (!%p255_p11), 15360  }
  0x28   : > { %s263_s24 = scalar_lea.vmem (!%p255_p11), [#allocation2], %s788_s22  ;;  %s789_s5 = sshll.u32 (!%p255_p11), %s261_s10, 6 }
  0x29   : > { %v307_v17 = vld [vmem:[%s263_s24] sm:$0xff] (!%p255_p11)  ;;  %v308_v18 = vld [vmem:[%s263_s24 + $0x8] sm:$0xff] (!%p255_p11)  ;;  %v309_v22 = vld [vmem:[%s263_s24 + $0x10] sm:$0xff] (!%p255_p11)  ;;  %s1163_s6 = scalar_lea.vmem (!%p255_p11), [#allocation3], %s789_s5  ;;  %p296_p13 = scmp.lt.s32.totalorder (!%p255_p11), %s1015_s14, 1 }
  0x2a   : > { %v797_v19 = vld [vmem:[%s263_s24 + $0x40] sm:$0xff] (!%p255_p11)  ;;  %v889_v20 = vpack.c.bf16 (!%p255_p11), %v308_v18, %v307_v17  ;;  %v798_v21 = vld [vmem:[%s263_s24 + $0x48] sm:$0xff] (!%p255_p11)  ;;  %v310_v23 = vld [vmem:[%s263_s24 + $0x18] sm:$0xff] (!%p255_p11) }
  0x2b   : > { %v905_v24 = vpack.c.bf16 (!%p255_p11), %v798_v21, %v797_v19  ;;  %v893_v25 = vpack.c.bf16 (!%p255_p11), %v310_v23, %v309_v22  ;;  %v799_v26 = vld [vmem:[%s263_s24 + $0x50] sm:$0xff] (!%p255_p11)  ;;  %v800_v27 = vld [vmem:[%s263_s24 + $0x58] sm:$0xff] (!%p255_p11)  ;;  %v311_v28 = vld [vmem:[%s263_s24 + $0x20] sm:$0xff] (!%p255_p11) }
  0x2c   : > { %890 = vmatprep.subr.bf16.mxu0 (!%p255_p11), %v889_v20  ;;  %v909_v29 = vpack.c.bf16 (!%p255_p11), %v800_v27, %v799_v26  ;;  %v312_v30 = vld [vmem:[%s263_s24 + $0x28] sm:$0xff] (!%p255_p11)  ;;  %v801_v31 = vld [vmem:[%s263_s24 + $0x60] sm:$0xff] (!%p255_p11)  ;;  %v313_v35 = vld [vmem:[%s263_s24 + $0x30] sm:$0xff] (!%p255_p11) }
  0x2d   : > { %v802_v32 = vld [vmem:[%s263_s24 + $0x68] sm:$0xff] (!%p255_p11)  ;;  %906 = vmatprep.subr.bf16.mxu1 (!%p255_p11), %v905_v24  ;;  %892 = vmatpush3.bf16.msra.mxu0 (!%p255_p11), %v889_v20  ;;  %v897_v33 = vpack.c.bf16 (!%p255_p11), %v312_v30, %v311_v28  ;;  %v314_v36 = vld [vmem:[%s263_s24 + $0x38] sm:$0xff] (!%p255_p11)  ;;  %v803_v37 = vld [vmem:[%s263_s24 + $0x70] sm:$0xff] (!%p255_p11) }
  0x2e   : > { %908 = vmatpush3.bf16.msra.mxu1 %v905_v24  ;;  %894 = vmatprep.subr.bf16.mxu0 %v893_v25  ;;  %v913_v34 = vpack.c.bf16 %v802_v32, %v801_v31  ;;  %v804_v38 = vld [vmem:[%s263_s24 + $0x78] sm:$0xff]  ;;  %v901_v39 = vpack.c.bf16 %v314_v36, %v313_v35  ;;  %s295_s12 = scalar_select %p294_p12, %s1019_s15, 1 }
  0x2f   : > { %910 = vmatprep.subr.bf16.mxu1 %v909_v29  ;;  %v917_v40 = vpack.c.bf16 %v804_v38, %v803_v37  ;;  %s297_s7 = scalar_select %p296_p13, %s1015_s14, 1 }
  0x30   : > { %s791_s9 = sshll.u32 %s295_s12, 3  ;;  %s820_s25 = sshll.u32 (%p1101_p6), %s1019_s15, 4 }
  0x31   : > { %896 = vmatpush3.bf16.msra.mxu0 %v893_v25  ;;  %s790_s8 = sshll.u32 %s297_s7, 2  ;;  %s600_s26 = sadd.s32 (%p1101_p6), %s1015_s14, %s820_s25 }
  0x32   : > { %912 = vmatpush3.bf16.msra.mxu1 %v909_v29  ;;  %898 = vmatprep.subr.bf16.mxu0 %v897_v33  ;;  %s300_s10 = sadd.s32 %s791_s9, %s790_s8  ;;  %s816_s23 = sshll.u32 (%p1101_p6), %s600_s26, 3 }
  0x33   : > { %914 = vmatprep.subr.bf16.mxu1 %v913_v34  ;;  %s792_s11 = sshll.u32 %s300_s10, 3  ;;  %s602_s30 = scalar_lea.vmem (%p1101_p6), %s1226_s2, %s816_s23 }
  0x34   : > { %s302_s24 = scalar_lea.vmem %s1227_s3, %s792_s11 }
  0x35   : > { %900 = vmatpush3.bf16.msra.mxu0 %v897_v33 }
  0x36   : > { %916 = vmatpush3.bf16.msra.mxu1 %v913_v34  ;;  %902 = vmatprep.subr.bf16.mxu0 %v901_v39 }
  0x37   : > { %918 = vmatprep.subr.bf16.mxu1 %v917_v40 }
  0x39   : > { %904 = vmatpush3.bf16.msra.mxu0 %v901_v39 }
  0x3a   : > { %920 = vmatpush3.bf16.msra.mxu1 %v917_v40 }
  0x3c   : > { %862 = vmatmul.mubr.msk.f32.vlgmr.msra.gmra.mrb[0].mxu0 %vm315_vm0, %v304_v41 }
  0x3d   : > { %884 = vmatmul.mubr.msk.f32.vlgmr.msra.gmra.mrb[0].mxu1 %vm315_vm0, %v304_v41  ;;  %864 = vmatprep.mubr.msk.f32.mxu0 %vm315_vm0, %v305_v42 }
  0x3e   : > { %886 = vmatprep.mubr.msk.f32.mxu1 %vm315_vm0, %v305_v42 }
  0x40   : > { %865 = vmatmul.mubr.msk.f32.gmra.mrb[2].mxu0 %vm315_vm0, %v306_v43 }
  0x41   : > { %887 = vmatmul.mubr.msk.f32.gmra.mrb[2].mxu1 %vm315_vm0, %v306_v43 }
 0x10f   : > { %v863_v44 = vpop.f32.mrb[0].mxu0 }
 0x110   : > { %414 = vst [vmem:[%s1163_s6 + $0x8] sm:$0xff] %v863_v44  ;;  %v885_v45 = vpop.f32.mrb[0].mxu1  ;;  %419 = vadd.xlane.f32.xlu0 %v863_v44  ;;  %v394_v46 = vpop.f32.mrb[1].mxu0  ;;  %v430_v48 = vmul.f32 %v863_v44, %v863_v44 }
 0x111   : > { %810 = vst [vmem:[%s1163_s6 + $0x28] sm:$0xff] %v885_v45  ;;  %546 = vadd.xlane.f32.xlu1 %v885_v45  ;;  %v520_v47 = vpop.f32.mrb[1].mxu1  ;;  %413 = vst [vmem:[%s1163_s6] sm:$0xff] %v394_v46  ;;  %v557_v53 = vmul.f32 %v885_v45, %v885_v45  ;;  %v429_v54 = vmul.f32 %v394_v46, %v394_v46 }
 0x112   : > { %809 = vst [vmem:[%s1163_s6 + $0x20] sm:$0xff] %v520_v47  ;;  %v556_v55 = vmul.f32 %v520_v47, %v520_v47 }
 0x113   : > { %v866_v49 = vpop.f32.mrb[2].mxu0 }
 0x114   : > { %417 = vadd.xlane.f32.xlu0 %v394_v46  ;;  %416 = vst [vmem:[%s1163_s6 + $0x18] sm:$0xff] %v866_v49  ;;  %v404_v50 = vpop.f32.mrb[3].mxu0  ;;  %v888_v51 = vpop.f32.mrb[2].mxu1  ;;  %v432_v57 = vmul.f32 %v866_v49, %v866_v49 }
 0x115   : > { %435 = vadd.xlane.f32.xlu1 %v430_v48  ;;  %415 = vst [vmem:[%s1163_s6 + $0x10] sm:$0xff] %v404_v50  ;;  %812 = vst [vmem:[%s1163_s6 + $0x38] sm:$0xff] %v888_v51  ;;  %v530_v52 = vpop.f32.mrb[3].mxu1  ;;  %v431_v56 = vmul.f32 %v404_v50, %v404_v50  ;;  %v559_v59 = vmul.f32 %v888_v51, %v888_v51 }
 0x116   : > { %811 = vst [vmem:[%s1163_s6 + $0x30] sm:$0xff] %v530_v52  ;;  %v558_v58 = vmul.f32 %v530_v52, %v530_v52 }
 0x117   : > { %v646_v25 = vld [vmem:[%s1163_s6 + $0x8] sm:$0xff] (%p1101_p6) }
 0x118   : > { %544 = vadd.xlane.f32.xlu0 %v520_v47  ;;  %v644_v24 = vld [vmem:[%s1163_s6] sm:$0xff] (%p1101_p6)  ;;  %v654_v29 = vld [vmem:[%s1163_s6 + $0x28] sm:$0xff] (%p1101_p6)  ;;  %647 = vst [vmem:[%s602_s30 + $0x10] sm:$0xff] (%p1101_p6), %v646_v25 }
 0x119   : > { %562 = vadd.xlane.f32.xlu1 %v557_v53  ;;  %v652_v28 = vld [vmem:[%s1163_s6 + $0x20] sm:$0xff] (%p1101_p6)  ;;  %645 = vst [vmem:[%s602_s30] sm:$0xff] (%p1101_p6), %v644_v24  ;;  %655 = vst [vmem:[%s602_s30 + $0x50] sm:$0xff] (%p1101_p6), %v654_v29 }
 0x11a   : > { %653 = vst [vmem:[%s602_s30 + $0x40] sm:$0xff] (%p1101_p6), %v652_v28 }
 0x11b   : > { %v650_v27 = vld [vmem:[%s1163_s6 + $0x18] sm:$0xff] (%p1101_p6) }
 0x11c   : > { %433 = vadd.xlane.f32.xlu0 %v429_v54  ;;  %v648_v26 = vld [vmem:[%s1163_s6 + $0x10] sm:$0xff] (%p1101_p6)  ;;  %v658_v31 = vld [vmem:[%s1163_s6 + $0x38] sm:$0xff] (%p1101_p6)  ;;  %651 = vst [vmem:[%s602_s30 + $0x30] sm:$0xff] (%p1101_p6), %v650_v27 }
 0x11d   : > { %423 = vadd.xlane.f32.xlu1 %v866_v49  ;;  %v656_v30 = vld [vmem:[%s1163_s6 + $0x30] sm:$0xff] (%p1101_p6)  ;;  %649 = vst [vmem:[%s602_s30 + $0x20] sm:$0xff] (%p1101_p6), %v648_v26  ;;  %659 = vst [vmem:[%s602_s30 + $0x70] sm:$0xff] (%p1101_p6), %v658_v31 }
 0x11e   : > { %657 = vst [vmem:[%s602_s30 + $0x60] sm:$0xff] (%p1101_p6), %v656_v30 }
 0x120   : > { %560 = vadd.xlane.f32.xlu0 %v556_v55 }
 0x121   : > { %550 = vadd.xlane.f32.xlu1 %v888_v51 }
 0x124   : > { %548 = vadd.xlane.f32.xlu0 %v530_v52 }
 0x125   : > { %421 = vadd.xlane.f32.xlu1 %v404_v50 }
 0x128   : > { %437 = vadd.xlane.f32.xlu0 %v431_v56 }
 0x129   : > { %439 = vadd.xlane.f32.xlu1 %v432_v57 }
 0x12c   : > { %564 = vadd.xlane.f32.xlu0 %v558_v58 }
 0x12d   : > { %566 = vadd.xlane.f32.xlu1 %v559_v59 }
 0x19d   : > { %v420_v60 = vpop.xlane.xlu0 %419 }
 0x19e   : > { %v547_v61 = vpop.xlane.xlu1 %546 }
 0x19f   : > { %v553_v2 = vadd.f32 %v547_v61, %v420_v60 }
 0x1a1   : > { %v418_v62 = vpop.xlane.xlu0 %417 }
 0x1a2   : > { %v436_v63 = vpop.xlane.xlu1 %435 }
 0x1a5   : > { %v545_v0 = vpop.xlane.xlu0 %544 }
 0x1a6   : > { %v563_v1 = vpop.xlane.xlu1 %562  ;;  %v552_v8 = vadd.f32 %v545_v0, %v418_v62 }
 0x1a7   : > { %v569_v3 = vadd.f32 %v563_v1, %v436_v63 }
 0x1a9   : > { %v574_v4 = vsel %vm572_vm1, %v553_v2, %v569_v3  ;;  %v434_v5 = vpop.xlane.xlu0 %433 }
 0x1aa   : > { %579 = vst.msk [vmem:[%s302_s24 + $0x8] sm:$0xff] %vm577_vm2, %v574_v4  ;;  %v424_v6 = vpop.xlane.xlu1 %423 }
 0x1ad   : > { %v561_v7 = vpop.xlane.xlu0 %560 }
 0x1ae   : > { %v568_v9 = vadd.f32 %v561_v7, %v434_v5  ;;  %v551_v10 = vpop.xlane.xlu1 %550 }
 0x1af   : > { %v555_v20 = vadd.f32 %v551_v10, %v424_v6 }
 0x1b0   : > { %v573_v11 = vsel %vm572_vm1, %v552_v8, %v568_v9 }
 0x1b1   : > { %578 = vst.msk [vmem:[%s302_s24] sm:$0xff] %vm577_vm2, %v573_v11  ;;  %v549_v12 = vpop.xlane.xlu0 %548 }
 0x1b2   : > { %v422_v13 = vpop.xlane.xlu1 %421 }
 0x1b3   : > { %v554_v17 = vadd.f32 %v549_v12, %v422_v13 }
 0x1b5   : > { %v438_v14 = vpop.xlane.xlu0 %437 }
 0x1b6   : > { %v440_v15 = vpop.xlane.xlu1 %439 }
 0x1b8   : > { %597 = sbr.rel (!%p1101_p6) target bundleno = 447 (0x1bf), region = 70 }
 0x1b9   : > { %v565_v16 = vpop.xlane.xlu0 %564 }
 0x1ba   : > { %v567_v18 = vpop.xlane.xlu1 %566  ;;  %v570_v19 = vadd.f32 %v565_v16, %v438_v14 }
 0x1bb   : > { %v571_v21 = vadd.f32 %v567_v18, %v440_v15 }
 0x1bc   : > { %v575_v22 = vsel %vm572_vm1, %v554_v17, %v570_v19 }
 0x1bd   : > { %v576_v23 = vsel %vm572_vm1, %v555_v20, %v571_v21  ;;  %580 = vst.msk [vmem:[%s302_s24 + $0x10] sm:$0xff] %vm577_vm2, %v575_v22 }
 0x1be   : > { %581 = vst.msk [vmem:[%s302_s24 + $0x18] sm:$0xff] %vm577_vm2, %v576_v23 }
 0x1bf PF: > { %s14_s18 = sadd.s32 1, %s1031_s18   ;;  %s1229_s12 = smov %s1011_s13 }
 0x1c0   : > { %p11_p0 = scmp.ge.s32.totalorder %s14_s18, 6   ;;  %s1230_s13 = smov %s1109_s27 }
 0x1c1   : > { %s1231_s14 = smov %s1023_s16  ;;  %s1232_s15 = smov %s1027_s17 }
 0x1c2   : > { %s1233_s16 = smov %s1236_s19  ;;  %s1234_s17 = smov %s1240_s20 }
 0x1c3   :  { %13 = sbr.rel (!%p11_p0) target bundleno = 4 (0x4), region = 153 }

</bundles_post_ra>
